<compile_context>
chip_gen: v7x
topology: tpu7x:2x2x1
jax: 0.10.0
libtpu: 0.0.40
codegen_flags: <defaults>
</compile_context>

<pallas_src>
import jax
import jax.numpy as jnp
from jax.experimental import pallas as pl
from jax.experimental.pallas import tpu as pltpu


_MAX_TILE_BYTES = 8 * 1024 * 1024       # 8 MiB per tile (per array, per buffer)
_VMEM_LIMIT_BYTES = 48 * 1024 * 1024    # 2 arrays x 2 buffers x 8 MiB + headroom


def basic_nn_kernel(params_ref, x_ref, o_ref):
    # params_ref (SMEM, scalar-prefetched):
    #   [w1_00, b1_0, w1_10, b1_1, w2_00, w2_01, final_bias]
    w1_00 = params_ref[0]
    b1_0 = params_ref[1]
    w1_10 = params_ref[2]
    b1_1 = params_ref[3]
    w2_00 = params_ref[4]
    w2_01 = params_ref[5]
    final_bias = params_ref[6]

    x = x_ref[...].astype(jnp.float32)

    top = jnp.maximum(x * w1_00 + b1_0, 0.0) * w2_00
    bot = jnp.maximum(x * w1_10 + b1_1, 0.0) * w2_01
    o_ref[...] = jnp.maximum(top + bot + final_bias, 0.0).astype(o_ref.dtype)


def basic_nn_forward(x, params, *, donate_input=False):
    """Elementwise BasicNN forward. x: any-shaped float array; params: f32[7]."""
    orig_shape = x.shape
    dtype = x.dtype
    n = int(x.size)
    if n == 0:
        return x

    flat = x.reshape(-1)  # contiguous flatten: free (no copy) in XLA

    # Lane width: largest multiple of 128 (<= 1024) that divides n, so the
    # 2-D reshape below is a free bitcast and no padding is needed.
    lanes = None
    for cand in (1024, 512, 256, 128):
        if n % cand == 0:
            lanes = cand
            break

    padded = lanes is None
    if padded:
        # TODO(synk): rare ragged case (n % 128 != 0) still pays one pad copy;
        # a fully 1-D masked-tail kernel would remove it.
        lanes = 128
        n_pad = pl.cdiv(n, lanes) * lanes
        flat = jnp.pad(flat, (0, n_pad - n))
    else:
        n_pad = n

    itemsize = jnp.dtype(dtype).itemsize
    rows = n_pad // lanes
    x2d = flat.reshape(rows, lanes)

    # Adaptive tile rows: full extent for small inputs (no artificial padding
    # floor), else up to an 8 MiB tile (rows a multiple of 8/16).  A ragged
    # last grid block is handled by Pallas (OOB writes are dropped).
    max_tile_rows = max(8, _MAX_TILE_BYTES // (lanes * itemsize))
    tile_rows = rows if rows <= max_tile_rows else max_tile_rows
    grid = (pl.cdiv(rows, tile_rows),)

    # Bandwidth-bound custom call: 1 read + 1 write, ~11 VALU ops/elem.
    cost = pl.CostEstimate(
        flops=11 * n,
        transcendentals=0,
        bytes_accessed=2 * n * itemsize,
    )

    extra_kwargs = {}
    if donate_input:
        # Input 0 is the scalar-prefetch params, input 1 is x2d.
        extra_kwargs["input_output_aliases"] = {1: 0}

    out2d = pl.pallas_call(
        basic_nn_kernel,
        out_shape=jax.ShapeDtypeStruct((rows, lanes), dtype),
        grid_spec=pltpu.PrefetchScalarGridSpec(
            num_scalar_prefetch=1,  # params land in SMEM, passed to index_maps
            grid=grid,
            in_specs=[
                pl.BlockSpec((tile_rows, lanes), lambda i, p_ref: (i, 0)),
            ],
            out_specs=pl.BlockSpec((tile_rows, lanes), lambda i, p_ref: (i, 0)),
        ),
        compiler_params=pltpu.CompilerParams(
            dimension_semantics=("parallel",),  # megacore sharding on v7x
            vmem_limit_bytes=_VMEM_LIMIT_BYTES,
        ),
        cost_estimate=cost,
        **extra_kwargs,
    )(params, x2d)

    if padded:
        return out2d.reshape(-1)[:n].reshape(orig_shape)
    return out2d.reshape(orig_shape)


def basic_nn_reference(x, params):
    w1_00, b1_0, w1_10, b1_1, w2_00, w2_01, final_bias = [params[i] for i in range(7)]
    xf = x.astype(jnp.float32)
    top = jnp.maximum(xf * w1_00 + b1_0, 0.0) * w2_00
    bot = jnp.maximum(xf * w1_10 + b1_1, 0.0) * w2_01
    return jnp.maximum(top + bot + final_bias, 0.0).astype(x.dtype)


if __name__ == "__main__":
    # Deterministic parameter values straight from BasicNN.__init__.
    params = jnp.array(
        [1.7, -0.85, 12.6, 0.0, -40.8, 2.7, -16.0], dtype=jnp.float32
    )

    key = jax.random.PRNGKey(0)
    k0, k1, k2 = jax.random.split(key, 3)

    # Main test: small f32 input, lane-aligned size (no padding, single block).
    x = jax.random.uniform(k0, (2, 4, 16, 16), dtype=jnp.float32)
    out = jax.block_until_ready(basic_nn_forward(x, params))
    ref = basic_nn_reference(x, params)
    assert out.shape == x.shape and out.dtype == x.dtype
    assert jnp.allclose(out, ref, atol=1e-5, rtol=1e-5)

    # Ragged size (n % 128 != 0): exercises the fallback path.
    x_ragged = jax.random.uniform(k1, (3, 5, 7), dtype=jnp.float32)
    out_r = jax.block_until_ready(basic_nn_forward(x_ragged, params))
    ref_r = basic_nn_reference(x_ragged, params)
    assert out_r.shape == x_ragged.shape
    assert jnp.allclose(out_r, ref_r, atol=1e-5, rtol=1e-5)

    # bf16 I/O: exercises the dtype cast on the store (compute stays f32).
    x_bf16 = jax.random.uniform(k2, (32, 1024), dtype=jnp.float32).astype(jnp.bfloat16)
    out_b = jax.block_until_ready(basic_nn_forward(x_bf16, params))
    ref_b = basic_nn_reference(x_bf16, params)
    assert out_b.dtype == jnp.bfloat16
    assert jnp.allclose(out_b.astype(jnp.float32), ref_b.astype(jnp.float32),
                        atol=1e-1, rtol=1e-2)

    print("KERNEL_OK")
</pallas_src>

<mosaic_0001>
module attributes {stable_mosaic.version = 11 : i64} {
  func.func @basic_nn_kernel(%arg0: i32, %arg1: memref<7xf32, #tpu.memory_space<smem>>, %arg2: memref<2x1024xf32, #tpu.memory_space<vmem>>, %arg3: memref<2x1024xf32, #tpu.memory_space<vmem>>) attributes {dimension_semantics = [#tpu.dimension_semantics<parallel>], iteration_bounds = array<i64: 1>, scalar_prefetch = 1 : i64, scratch_operands = 0 : i64, tpu.core_type = #tpu.core_type<tc>, window_params = [{transform_indices = @transform_0, window_bounds = array<i64: 2, 1024>}, {transform_indices = @transform_1, window_bounds = array<i64: 2, 1024>}]} {
    %c0 = arith.constant 0 : index
    %0 = memref.load %arg1[%c0] : memref<7xf32, #tpu.memory_space<smem>>
    %c1 = arith.constant 1 : index
    %1 = memref.load %arg1[%c1] : memref<7xf32, #tpu.memory_space<smem>>
    %c2 = arith.constant 2 : index
    %2 = memref.load %arg1[%c2] : memref<7xf32, #tpu.memory_space<smem>>
    %c3 = arith.constant 3 : index
    %3 = memref.load %arg1[%c3] : memref<7xf32, #tpu.memory_space<smem>>
    %c4 = arith.constant 4 : index
    %4 = memref.load %arg1[%c4] : memref<7xf32, #tpu.memory_space<smem>>
    %c5 = arith.constant 5 : index
    %5 = memref.load %arg1[%c5] : memref<7xf32, #tpu.memory_space<smem>>
    %c6 = arith.constant 6 : index
    %6 = memref.load %arg1[%c6] : memref<7xf32, #tpu.memory_space<smem>>
    %c0_0 = arith.constant 0 : index
    %c0_1 = arith.constant 0 : index
    %7 = vector.load %arg2[%c0_0, %c0_1] : memref<2x1024xf32, #tpu.memory_space<vmem>>, vector<2x1024xf32>
    %8 = vector.broadcast %0 : f32 to vector<2x1024xf32>
    %9 = arith.mulf %7, %8 : vector<2x1024xf32>
    %10 = vector.broadcast %1 : f32 to vector<2x1024xf32>
    %11 = arith.addf %9, %10 : vector<2x1024xf32>
    %cst = arith.constant 0.000000e+00 : f32
    %12 = vector.broadcast %cst : f32 to vector<2x1024xf32>
    %13 = arith.maximumf %11, %12 : vector<2x1024xf32>
    %14 = vector.broadcast %4 : f32 to vector<2x1024xf32>
    %15 = arith.mulf %13, %14 : vector<2x1024xf32>
    %16 = vector.broadcast %2 : f32 to vector<2x1024xf32>
    %17 = arith.mulf %7, %16 : vector<2x1024xf32>
    %18 = vector.broadcast %3 : f32 to vector<2x1024xf32>
    %19 = arith.addf %17, %18 : vector<2x1024xf32>
    %cst_2 = arith.constant 0.000000e+00 : f32
    %20 = vector.broadcast %cst_2 : f32 to vector<2x1024xf32>
    %21 = arith.maximumf %19, %20 : vector<2x1024xf32>
    %22 = vector.broadcast %5 : f32 to vector<2x1024xf32>
    %23 = arith.mulf %21, %22 : vector<2x1024xf32>
    %24 = arith.addf %15, %23 : vector<2x1024xf32>
    %25 = vector.broadcast %6 : f32 to vector<2x1024xf32>
    %26 = arith.addf %24, %25 : vector<2x1024xf32>
    %cst_3 = arith.constant 0.000000e+00 : f32
    %27 = vector.broadcast %cst_3 : f32 to vector<2x1024xf32>
    %28 = arith.maximumf %26, %27 : vector<2x1024xf32>
    %c0_4 = arith.constant 0 : index
    %c0_5 = arith.constant 0 : index
    %29 = vector.load %arg3[%c0_4, %c0_5] : memref<2x1024xf32, #tpu.memory_space<vmem>>, vector<2x1024xf32>
    tpu.vector_store %arg3[%c0_4, %c0_5], %28 {strides = array<i32>} : memref<2x1024xf32, #tpu.memory_space<vmem>>, vector<2x1024xf32>,
    return
  }
  func.func @transform_0(%arg0: i32, %arg1: memref<7xf32, #tpu.memory_space<smem>>) -> (i32, i32) {
    %c0_i32 = arith.constant 0 : i32
    %c0_i32_0 = arith.constant 0 : i32
    return %arg0, %c0_i32 : i32, i32
  }
  func.func @transform_1(%arg0: i32, %arg1: memref<7xf32, #tpu.memory_space<smem>>) -> (i32, i32) {
    %c0_i32 = arith.constant 0 : i32
    %c0_i32_0 = arith.constant 0 : i32
    return %arg0, %c0_i32 : i32, i32
  }
}

</mosaic_0001>

<bundles_post_ra>
// kernel: tpu_custom_call.1
= control target key start
LH: loop header
LB: loop body
LE: loop exit
PB: predicated region body
PF: predicated region fallthrough
CT: control target
= control target key end

     0   :  { %s204_s0 = inlined_call_operand.hbm [shape: f32[7], index: 0, kind: input, shape index: {}]   ;;  %s205_s1 = inlined_call_operand.hbm [shape: f32[2,1024], index: 1, kind: input, shape index: {}]   ;;  %s206_s2 = inlined_call_operand.hbm [shape: f32[2,1024], index: 2, kind: output, shape index: {}]  }
   0x1   :  { %s90_s11 = scalar_lea.hbm %s204_s0, 16 }
   0x2   :  { %p91_p0 = scmp.ne.s32.totalorder %s204_s0, %s90_s11  ;;  %p94_p1 = scmp.lt.u32.totalorder %s90_s11, %s204_s0 }
   0x4   :  { %p96_p2 = pnand %p94_p1, %p91_p0 }
   0x6   :  { %99 = shalt.err (!%p96_p2)  }
   0x7   :  { %s150_s16 = smov [#allocation3]  }
   0x8   :  { %8 = dma.hbm_to_smem %s204_s0, 16, %s150_s16, [#allocation2] }
   0x9   :  { %144 = dma.done.wait [#allocation2], 16 }
   0xa   :  { %145 = vsyncadd [#allocation2], 4294967280 }
   0xb   :  { %10 = sfence }
   0xc   :  { %11 = vsyncpa [#allocation5], 0 }
   0xd   :  { %12 = vsyncpa [#allocation6], 0  ;;  %s151_s19 = smov [#allocation4]   ;;  %s100_s23 = scalar_lea.hbm %s205_s1, 256 }
   0xe   :  { %s19_s20 = sshll.u32 %s151_s19, 4  ;;  %p101_p3 = scmp.ne.s32.totalorder %s205_s1, %s100_s23  ;;  %s20_s20 = int_to_ptr.vmem [resolvable:$true] %s19_s20 }
   0xf   :  { %p104_p4 = scmp.lt.u32.totalorder %s100_s23, %s205_s1 }
  0x11   :  { %p106_p5 = pnand %p104_p4, %p101_p3 }
  0x13   :  { %109 = shalt.err (!%p106_p5)
}
  0x14   :  { %s110_s0 = scalar_lea.vmem %s20_s20, 256  ;;  %p115_p7 = scmp.lt.s32.totalorder %s20_s20, %s20_s20 }
  0x15   :  { %p111_p6 = scmp.ne.s32.totalorder %s20_s20, %s110_s0  ;;  %p116_p8 = scmp.lt.s32.totalorder %s110_s0, %s110_s0 }
  0x17   :  { %p117_p9 = por %p116_p8, %p115_p7 }
  0x19   :  { %p118_p10 = pnand %p117_p9, %p111_p6 }
  0x1b   :  { %121 = shalt.err (!%p118_p10)
}
  0x1c   :  { %22 = dma.hbm_to_vmem [thread:$0]  %s205_s1, 256, %s20_s20, [#allocation5]  }
  0x1d   :  { %146 = dma.done.wait [#allocation5], 256  }
  0x1e   :  { %147 = vsyncadd [#allocation5], 4294967040  ;;  %s26_s30 = sld [smem:[#allocation3]]  ;;  %s81_s3 = sld [smem:[#allocation3 + $0x1]]  ;;  %v33_v0 = vld [vmem:[#allocation4] sm:$0xff]  ;;  %v34_v3 = vld [vmem:[#allocation4 + $0x8] sm:$0xff] }
  0x1f   :  { %s82_s4 = sld [smem:[#allocation3 + $0x2]]  ;;  %s83_s5 = sld [smem:[#allocation3 + $0x3]] }
  0x20   :  { %s84_s6 = sld [smem:[#allocation3 + $0x4]]  ;;  %s85_s7 = sld [smem:[#allocation3 + $0x5]] }
  0x21   :  { %s86_s8 = sld [smem:[#allocation3 + $0x6]]  ;;  %s152_s1 = smov [#allocation7]  }
  0x22   :  { %s72_s9 = sshll.u32 %s152_s1, 4  ;;  %s73_s9 = int_to_ptr.vmem [resolvable:$true] %s72_s9 }
  0x23   :  { %s122_s10 = scalar_lea.vmem %s73_s9, 256  ;;  %p127_p12 = scmp.lt.s32.totalorder %s73_s9, %s73_s9 }
  0x24   :  { %v35_v1 = vstv %s26_s30  ;;  %v38_v2 = vstv %s81_s3  ;;  %p123_p11 = scmp.ne.s32.totalorder %s73_s9, %s122_s10  ;;  %p128_p13 = scmp.lt.s32.totalorder %s122_s10, %s122_s10 }
  0x25   :  { %v36_v4 = vmul.f32 %v35_v1, %v33_v0  ;;  %v46_v5 = vstv %s82_s4  ;;  %v49_v6 = vstv %s83_s5  ;;  %v37_v7 = vmul.f32 %v35_v1, %v34_v3 }
  0x26   :  { %v47_v8 = vmul.f32 %v46_v5, %v33_v0  ;;  %v48_v9 = vmul.f32 %v46_v5, %v34_v3  ;;  %v43_v12 = vstv %s84_s6  ;;  %v54_v16 = vstv %s85_s7  ;;  %p129_p0 = por %p128_p13, %p127_p12 }
  0x27   :  { %v39_v10 = vadd.f32 %v38_v2, %v36_v4  ;;  %v40_v11 = vadd.f32 %v38_v2, %v37_v7  ;;  %v59_v24 = vstv %s86_s8 }
  0x28   :  { %v50_v13 = vadd.f32 %v49_v6, %v47_v8  ;;  %v51_v14 = vadd.f32 %v49_v6, %v48_v9  ;;  %p130_p1 = pnand %p129_p0, %p123_p11 }
  0x29   :  { %v41_v15 = vmax.f32 %v39_v10, 0.0  ;;  %v42_v17 = vmax.f32 %v40_v11, 0.0 }
  0x2a   :  { %v52_v18 = vmax.f32 %v50_v13, 0.0  ;;  %v53_v19 = vmax.f32 %v51_v14, 0.0 }
  0x2b   :  { %v44_v20 = vmul.f32 %v43_v12, %v41_v15  ;;  %v45_v21 = vmul.f32 %v43_v12, %v42_v17 }
  0x2c   :  { %v55_v22 = vmul.f32 %v54_v16, %v52_v18  ;;  %v56_v23 = vmul.f32 %v54_v16, %v53_v19 }
  0x2e   :  { %v57_v25 = vadd.f32 %v55_v22, %v44_v20  ;;  %v58_v26 = vadd.f32 %v56_v23, %v45_v21 }
  0x30   :  { %v60_v27 = vadd.f32 %v59_v24, %v57_v25  ;;  %v61_v28 = vadd.f32 %v59_v24, %v58_v26 }
  0x32   :  { %v62_v29 = vmax.f32 %v60_v27, 0.0  ;;  %v63_v30 = vmax.f32 %v61_v28, 0.0 }
  0x34   :  { %64 = vst [vmem:[#allocation7] sm:$0xff] %v62_v29  ;;  %65 = vst [vmem:[#allocation7 + $0x8] sm:$0xff] %v63_v30 }
  0x35   :  { %133 = shalt.err (!%p130_p1)
}
  0x36   :  { %s134_s13 = scalar_lea.hbm %s206_s2, 256 }
  0x37   :  { %p135_p2 = scmp.ne.s32.totalorder %s206_s2, %s134_s13  ;;  %p138_p3 = scmp.lt.u32.totalorder %s134_s13, %s206_s2 }
  0x39   :  { %p140_p4 = pnand %p138_p3, %p135_p2 }
  0x3b   :  { %143 = shalt.err (!%p140_p4)
}
  0x3c   :  { %75 = dma.vmem_to_hbm [thread:$0]  %s73_s9, 256, %s206_s2, [#allocation6]  }
  0x3d   :  { %148 = dma.done.wait [#allocation6], 256  }
  0x3e   :  { %149 = vsyncadd [#allocation6], 4294967040 }
  0x3f   :  { %79 = vsyncpa [#allocation5], 1 }
  0x40   :  { %80 = vsyncpa [#allocation6], 1 }

</bundles_post_ra>
